<compile_context>
chip_gen: v5e
topology: v5e:2x2
jax: 0.10.0
libtpu: 0.0.40
codegen_flags: <defaults>
</compile_context>

<pallas_src>
import jax
import jax.numpy as jnp
from jax.experimental import pallas as pl
from jax.experimental.pallas import tpu as pltpu


def _attention_kernel(x_ref, w_ref, ctx_ref, attw_ref):
    # x_ref:    (bt, S, D) slab of lstm_output (S on sublanes, D on lanes)
    # w_ref:    (1, D)     score-projection weight row (f32)
    # ctx_ref:  (bt, D)    context vectors
    # attw_ref: (bt, S)    attention weights (reshaped to (B, S, 1) in wrapper)
    x = x_ref[...].astype(jnp.float32)                   # (bt, S, D)
    w = w_ref[...].reshape(1, 1, -1)                     # (1, 1, D)

    # Score projection: VPU multiply + lane-axis (D) reduce on the XLU.
    scores = jnp.sum(x * w, axis=-1)                     # (bt, S)

    # Softmax over the sequence axis (== PyTorch dim=1).
    m = jnp.max(scores, axis=-1, keepdims=True)          # (bt, 1)
    e = jnp.exp(scores - m)                              # (bt, S)
    denom = jnp.sum(e, axis=-1, keepdims=True)           # (bt, 1)
    attn = e / denom                                     # exact divide (parity)

    # context = sum_s attn * x : VPU multiply + sublane (S) reduce.
    ctx = jnp.sum(attn[:, :, None] * x, axis=1)          # (bt, D)

    ctx_ref[...] = ctx.astype(ctx_ref.dtype)
    attw_ref[...] = attn.astype(attw_ref.dtype)


def _round_up(x, m):
    return ((x + m - 1) // m) * m


def _pick_batch_tile(B, S, D, in_itemsize):
    """Largest batch tile whose layout-padded VMEM footprint fits a budget
    that is valid on v5e/v6e/v7x (under the 32 MiB vmem_limit set below)."""
    # Per batch row: the x block occupies round_up(S,8) x round_up(D,128)
    # elements in VMEM (D = 2H is usually << 128, so padding dominates).
    x_row_in = _round_up(S, 8) * _round_up(D, 128) * in_itemsize
    x_row_f32 = _round_up(S, 8) * _round_up(D, 128) * 4
    out_row = (_round_up(D, 128) + _round_up(S, 128)) * 4
    # 2x double-buffered input, 2x double-buffered outputs, plus roughly two
    # f32 block-sized intermediates (f32 working copy + attn-weighted product).
    per_row = 2 * x_row_in + 2 * out_row + 2 * x_row_f32
    budget = 24 * 1024 * 1024
    bt = (budget // per_row) // 8 * 8
    bt = int(max(8, min(bt, 4096)))

    if bt < B:
        return bt
    # Whole batch fits in one block.  If it is large enough to split while
    # keeping blocks in the efficient-DMA regime, use two blocks so the
    # "parallel" batch axis can span both v7x TensorCores.
    half = _round_up(-(-B // 2), 8)
    if B > 8 and half * S * D * in_itemsize >= 512 * 1024:
        return half
    return B


def attention_layer(lstm_output, weight, bias=None):
    """lstm_output: (B, S, D) with D = 2*hidden; weight: (1, D); bias: (1,).

    The bias is constant along the softmax (seq) axis, so it cancels in the
    softmax and affects neither returned tensor; the kernel omits it.
    """
    del bias
    B, S, D = lstm_output.shape
    dtype = lstm_output.dtype
    in_itemsize = jnp.dtype(dtype).itemsize

    bt = _pick_batch_tile(B, S, D, in_itemsize)
    grid = (pl.cdiv(B, bt),)

    w_row = weight.reshape(1, D).astype(jnp.float32)

    ctx, attw = pl.pallas_call(
        _attention_kernel,
        out_shape=(
            jax.ShapeDtypeStruct((B, D), dtype),
            jax.ShapeDtypeStruct((B, S), jnp.float32),   # lane-dense (B, S)
        ),
        grid_spec=pltpu.PrefetchScalarGridSpec(
            num_scalar_prefetch=0,
            grid=grid,
            in_specs=[
                pl.BlockSpec((bt, S, D), lambda b: (b, 0, 0)),
                pl.BlockSpec((1, D), lambda b: (0, 0)),
            ],
            out_specs=(
                pl.BlockSpec((bt, D), lambda b: (b, 0)),
                pl.BlockSpec((bt, S), lambda b: (b, 0)),
            ),
        ),
        compiler_params=pltpu.CompilerParams(
            dimension_semantics=("parallel",),
            vmem_limit_bytes=32 * 1024 * 1024,
        ),
    )(lstm_output, w_row)

    attn_w = attw.reshape(B, S, 1)   # layout-free reshape in XLA
    return ctx, attn_w


def attention_layer_ref(lstm_output, weight, bias):
    """Pure-JAX reference mirroring the PyTorch forward (bias included)."""
    scores = jnp.einsum("bsd,od->bso", lstm_output, weight) + bias   # (B,S,1)
    attn_w = jax.nn.softmax(scores, axis=1)
    ctx = jnp.sum(attn_w * lstm_output, axis=1)
    return ctx, attn_w


if __name__ == "__main__":
    # hidden_size=16 -> D = 2*16 = 32
    B, S, hidden = 2, 8, 16
    D = 2 * hidden

    key = jax.random.PRNGKey(0)
    k_x, k_w, k_b = jax.random.split(key, 3)

    lstm_output = jax.random.normal(k_x, (B, S, D), dtype=jnp.float32)
    # Deterministic synthetic parameters for nn.Linear(hidden*2, 1)
    weight = jax.random.normal(k_w, (1, D), dtype=jnp.float32) * 0.1
    bias = jax.random.normal(k_b, (1,), dtype=jnp.float32) * 0.1

    ctx, attn_w = attention_layer(lstm_output, weight, bias)
    ctx = jax.block_until_ready(ctx)
    attn_w = jax.block_until_ready(attn_w)

    ctx_ref, attn_w_ref = attention_layer_ref(lstm_output, weight, bias)

    assert ctx.shape == (B, D)
    assert attn_w.shape == (B, S, 1)
    assert jnp.allclose(ctx, ctx_ref, atol=1e-4, rtol=1e-4)
    assert jnp.allclose(attn_w, attn_w_ref, atol=1e-5, rtol=1e-4)

    print("KERNEL_OK")
</pallas_src>

<mosaic_0001>
module attributes {stable_mosaic.version = 11 : i64} {
  func.func @_attention_kernel(%arg0: i32, %arg1: memref<2x8x32xf32, #tpu.memory_space<vmem>>, %arg2: memref<1x32xf32, #tpu.memory_space<vmem>>, %arg3: memref<2x32xf32, #tpu.memory_space<vmem>>, %arg4: memref<2x8xf32, #tpu.memory_space<vmem>>) attributes {dimension_semantics = [#tpu.dimension_semantics<parallel>], iteration_bounds = array<i64: 1>, scalar_prefetch = 0 : i64, scratch_operands = 0 : i64, tpu.core_type = #tpu.core_type<tc>, window_params = [{transform_indices = @transform_0, window_bounds = array<i64: 2, 8, 32>}, {pipeline_mode = #tpu.pipeline_mode<synchronous>, transform_indices = @transform_1, window_bounds = array<i64: 1, 32>}, {transform_indices = @transform_2, window_bounds = array<i64: 2, 32>}, {transform_indices = @transform_3, window_bounds = array<i64: 2, 8>}]} {
    %c0 = arith.constant 0 : index
    %c0_0 = arith.constant 0 : index
    %c0_1 = arith.constant 0 : index
    %0 = vector.load %arg1[%c0, %c0_0, %c0_1] : memref<2x8x32xf32, #tpu.memory_space<vmem>>, vector<2x8x32xf32>
    %c0_2 = arith.constant 0 : index
    %c0_3 = arith.constant 0 : index
    %1 = vector.load %arg2[%c0_2, %c0_3] : memref<1x32xf32, #tpu.memory_space<vmem>>, vector<1x32xf32>
    %2 = vector.shape_cast %1 : vector<1x32xf32> to vector<1x1x32xf32>
    %3 = vector.broadcast %2 : vector<1x1x32xf32> to vector<2x8x32xf32>
    %4 = arith.mulf %0, %3 : vector<2x8x32xf32>
    %cst = arith.constant dense<0.000000e+00> : vector<2x8xf32>
    %5 = vector.multi_reduction <add>, %4, %cst [2] : vector<2x8x32xf32> to vector<2x8xf32>
    %cst_4 = arith.constant dense<0xFF800000> : vector<2xf32>
    %6 = vector.multi_reduction <maximumf>, %5, %cst_4 [1] : vector<2x8xf32> to vector<2xf32>
    %7 = vector.shape_cast %6 : vector<2xf32> to vector<2x1xf32>
    %8 = vector.broadcast %7 : vector<2x1xf32> to vector<2x8xf32>
    %9 = arith.subf %5, %8 : vector<2x8xf32>
    %10 = math.exp %9 : vector<2x8xf32>
    %cst_5 = arith.constant dense<0.000000e+00> : vector<2xf32>
    %11 = vector.multi_reduction <add>, %10, %cst_5 [1] : vector<2x8xf32> to vector<2xf32>
    %12 = vector.shape_cast %11 : vector<2xf32> to vector<2x1xf32>
    %13 = vector.broadcast %12 : vector<2x1xf32> to vector<2x8xf32>
    %14 = arith.divf %10, %13 : vector<2x8xf32>
    %15 = vector.shape_cast %14 : vector<2x8xf32> to vector<2x8x1xf32>
    %16 = vector.broadcast %15 : vector<2x8x1xf32> to vector<2x8x32xf32>
    %17 = arith.mulf %16, %0 : vector<2x8x32xf32>
    %cst_6 = arith.constant dense<0.000000e+00> : vector<2x32xf32>
    %18 = vector.multi_reduction <add>, %17, %cst_6 [1] : vector<2x8x32xf32> to vector<2x32xf32>
    %c0_7 = arith.constant 0 : index
    %c0_8 = arith.constant 0 : index
    %19 = vector.load %arg3[%c0_7, %c0_8] : memref<2x32xf32, #tpu.memory_space<vmem>>, vector<2x32xf32>
    tpu.vector_store %arg3[%c0_7, %c0_8], %18 {strides = array<i32>} : memref<2x32xf32, #tpu.memory_space<vmem>>, vector<2x32xf32>,
    %c0_9 = arith.constant 0 : index
    %c0_10 = arith.constant 0 : index
    %20 = vector.load %arg4[%c0_9, %c0_10] : memref<2x8xf32, #tpu.memory_space<vmem>>, vector<2x8xf32>
    tpu.vector_store %arg4[%c0_9, %c0_10], %14 {strides = array<i32>} : memref<2x8xf32, #tpu.memory_space<vmem>>, vector<2x8xf32>,
    return
  }
  func.func @transform_0(%arg0: i32) -> (i32, i32, i32) {
    %c0_i32 = arith.constant 0 : i32
    %c0_i32_0 = arith.constant 0 : i32
    %c0_i32_1 = arith.constant 0 : i32
    return %arg0, %c0_i32, %c0_i32_0 : i32, i32, i32
  }
  func.func @transform_1(%arg0: i32) -> (i32, i32) {
    %c0_i32 = arith.constant 0 : i32
    %c0_i32_0 = arith.constant 0 : i32
    %c0_i32_1 = arith.constant 0 : i32
    return %c0_i32, %c0_i32_0 : i32, i32
  }
  func.func @transform_2(%arg0: i32) -> (i32, i32) {
    %c0_i32 = arith.constant 0 : i32
    %c0_i32_0 = arith.constant 0 : i32
    return %arg0, %c0_i32 : i32, i32
  }
  func.func @transform_3(%arg0: i32) -> (i32, i32) {
    %c0_i32 = arith.constant 0 : i32
    %c0_i32_0 = arith.constant 0 : i32
    return %arg0, %c0_i32 : i32, i32
  }
}

</mosaic_0001>

<bundles_post_ra>
// kernel: tpu_custom_call.1
= control target key start
LH: loop header
LB: loop body
LE: loop exit
PB: predicated region body
PF: predicated region fallthrough
CT: control target
= control target key end

     0   :  { %9 = vsyncpa [#allocation3], 0  ;;  %s394_s0 = inlined_call_operand.hbm [shape: f32[2,8,32], index: 0, kind: input, shape index: {}]   ;;  %s395_s1 = inlined_call_operand.hbm [shape: f32[1,32], index: 1, kind: input, shape index: {}]   ;;  %s396_s2 = inlined_call_operand.hbm [shape: f32[2,32], index: 2, kind: output, shape index: {0}]   ;;  %s397_s3 = inlined_call_operand.hbm [shape: f32[2,8], index: 3, kind: output, shape index: {1}]  }
   0x1   :  { %10 = vsyncpa [#allocation6], 0 }
   0x2   :  { %11 = vsyncpa [#allocation4], 0 }
   0x3   :  { %12 = vsyncpa [#allocation9], 0  ;;  %s17_s14 = sshll.u32 %s394_s0, 4  ;;  %s328_s15 = smov [#allocation2]   ;;  %s18_s14 = int_to_ptr.hbm [resolvable:$true] %s17_s14 }
   0x4   :  { %s19_s16 = sshll.u32 %s328_s15, 4  ;;  %s31_s19 = sshll.u32 %s395_s1, 4  ;;  %s20_s16 = int_to_ptr.vmem [resolvable:$true] %s19_s16  ;;  %s32_s19 = int_to_ptr.hbm [resolvable:$true] %s31_s19 }
   0x5   :  { %s329_s20 = smov 128   ;;  %s330_s21 = smov 8  }
   0x6   :  { %25 = dma.hbm_to_vmem [thread:$0]  %s18_s14, 256, %s20_s16, [#allocation3], %s329_s20, %s329_s20, %s330_s21  }
   0x7   :  { %s331_s22 = smov [#allocation5]  }
   0x8   :  { %s33_s23 = sshll.u32 %s331_s22, 4  ;;  %s34_s23 = int_to_ptr.vmem [resolvable:$true] %s33_s23 }
   0x9   :  { %36 = dma.hbm_to_vmem [thread:$0]  %s32_s19, 16, %s34_s23, [#allocation6]  }
   0xa   :  { %320 = dma.done.wait [#allocation3], 256  }
   0xb   :  { %321 = vsyncadd [#allocation3], 4294967040 }
   0xc   :  { %322 = dma.done.wait [#allocation6], 16  }
   0xd   :  { %323 = vsyncadd [#allocation6], 4294967280  ;;  %v361_v0 = vld [vmem:[#allocation2] sm:$0xff]  ;;  %v215_v1 = vld [vmem:[#allocation5] ss:$0 sm:$0xff]  ;;  %vm53_vm0 = vcmask 261120   ;;  %v62_v8 = vlaneseq }
   0xe   :  { %v51_v2 = vmul.f32 %v215_v1, %v361_v0  ;;  %v364_v3 = vld [vmem:[#allocation2 + $0x8] sm:$0xff]  ;;  %vm66_vm1 = vcmask 1041409   ;;  %vm69_vm2 = vcmask 58368   ;;  %v332_v15 = vmov 0   ;;  %s333_s0 = smov [#allocation8]   ;;  %s189_s26 = sshll.u32 %s397_s3, 4  ;;  %s190_s26 = int_to_ptr.hbm [resolvable:$true] %s189_s26 }
   0xf   :  { %v52_v5 = vmul.f32 %v215_v1, %v364_v3  ;;  %v369_v9 = vand.u32 127, %v62_v8  ;;  %213 = vset.pattern.permute.xlu2 %v332_v15  ;;  %212 = vset.pattern.permute.xlu1 %v332_v15  ;;  %s187_s1 = sshll.u32 %s333_s0, 4  ;;  %s334_s3 = smov [#allocation7]   ;;  %vm164_vm11 = vcmask 254976   ;;  %s188_s1 = int_to_ptr.vmem [resolvable:$true] %s187_s1 }
  0x10   :  { %v54_v4 = vsel %vm53_vm0, %v51_v2, 0.0  ;;  %214 = vset.pattern.permute.xlu0 %v332_v15  ;;  %s176_s27 = sshll.u32 %s334_s3, 4  ;;  %s178_s30 = sshll.u32 %s396_s2, 4  ;;  %s177_s27 = int_to_ptr.vmem [resolvable:$true] %s176_s27  ;;  %s179_s30 = int_to_ptr.hbm [resolvable:$true] %s178_s30 }
  0x11   :  { %55 = vadd.xlane.f32.xlu0 %v54_v4  ;;  %v57_v6 = vsel %vm53_vm0, %v52_v5, 0.0 }
  0x19   :  { %58 = vadd.xlane.f32.xlu0 %v57_v6 }
  0x84   :  { %v56_v7 = vpop.xlane.xlu0 %55 }
  0x85   :  { %v64_v11 = vperm.slane %v56_v7, %v369_v9 }
  0x8c   :  { %v59_v10 = vpop.xlane.xlu0 %58 }
  0x8d   :  { %v65_v12 = vperm.slane %v59_v10, %v369_v9 }
  0x8f   :  { %v67_v13 = vsel %vm66_vm1, %v65_v12, %v64_v11 }
  0x90   :  { %v70_v14 = vsel %vm69_vm2, %v67_v13, -inf }
  0x91   :  { %71 = vmax.xlane.f32.xlu1 %v70_v14 }
 0x104   :  { %v72_v16 = vpop.xlane.xlu1 %71 }
 0x105   :  { %v74_v17 = vperm.slane %v72_v16, 0  ;;  %v75_v18 = vperm.slane %v72_v16, 1 }
 0x107   :  { %v78_v19 = vsub.f32 %v56_v7, %v74_v17  ;;  %v79_v20 = vsub.f32 %v59_v10, %v75_v18 }
 0x109   :  { %v80_v21 = vmul.f32 1.442695, %v78_v19  ;;  %v82_v22 = vmul.f32 1.442695, %v79_v20 }
 0x10b   :  { %216 = vpow2.f32 %v80_v21 }
 0x10c   :  { %218 = vpow2.f32 %v82_v22 }
 0x111   :  { %v217_v23 = vpop.eup %216 }
 0x112   :  { %v219_v24 = vpop.eup %218  ;;  %87 = vperm.xlu1 %212, %v217_v23  }
 0x113   :  { %90 = vperm.xlu2 %213, %v219_v24  }
 0x16d   :  { %v91_v25 = vpop.permute.xlu2 %90 }
 0x16e   :  { %v93_v27 = vperm.slane %v91_v25, %v369_v9 }
 0x184   :  { %v88_v26 = vpop.permute.xlu1 %87 }
 0x185   :  { %v92_v28 = vperm.slane %v88_v26, %v369_v9 }
 0x187   :  { %v94_v29 = vsel %vm66_vm1, %v93_v27, %v92_v28 }
 0x188   :  { %v96_v30 = vsel %vm69_vm2, %v94_v29, 0.0 }
 0x189   :  { %97 = vadd.xlane.f32.xlu2 %v96_v30 }
 0x1fc   :  { %v98_v31 = vpop.xlane.xlu2 %97 }
 0x1fd   :  { %v100_v32 = vperm.slane %v98_v31, 0  ;;  %v101_v33 = vperm.slane %v98_v31, 1 }
 0x1ff   :  { %220 = vrcp.f32 %v100_v32  ;;  %v115_v40 = vand.u32 2147483648, %v100_v32  ;;  %v130_v41 = vand.u32 2147483648, %v101_v33  ;;  %v113_v43 = vand.u32 2147483647, %v100_v32 }
 0x200   :  { %222 = vrcp.f32 %v101_v33  ;;  %v128_v45 = vand.u32 2147483647, %v101_v33  ;;  %vm109_vm5 = vweird.f32 %v100_v32  ;;  %vm124_vm6 = vweird.f32 %v101_v33 }
 0x201   :  { %v116_v48 = vor.u32 1.1754944e-38, %v115_v40  ;;  %v131_v49 = vor.u32 1.1754944e-38, %v130_v41  ;;  %vm114_vm9 = vcmp.eq.f32.partialorder %v113_v43, 8.507059e+37 }
 0x202   :  { %vm129_vm10 = vcmp.eq.f32.partialorder %v128_v45, 8.507059e+37 }
 0x205   :  { %v221_v34 = vpop.eup %220 }
 0x206   :  { %v223_v35 = vpop.eup %222  ;;  %v105_v36 = vmul.f32 %v221_v34, %v100_v32  ;;  %vm110_vm3 = vweird.f32 %v221_v34 }
 0x207   :  { %v120_v37 = vmul.f32 %v223_v35, %v101_v33  ;;  %vm125_vm4 = vweird.f32 %v223_v35  ;;  %vm111_vm7 = vmor %vm109_vm5, %vm110_vm3 }
 0x208   :  { %v106_v38 = vsub.f32 1.0, %v105_v36  ;;  %vm126_vm8 = vmor %vm124_vm6, %vm125_vm4 }
 0x209   :  { %v121_v39 = vsub.f32 1.0, %v120_v37 }
 0x20a   :  { %v107_v42 = vmul.f32 %v221_v34, %v106_v38 }
 0x20b   :  { %v122_v44 = vmul.f32 %v223_v35, %v121_v39 }
 0x20c   :  { %v108_v46 = vadd.f32 %v221_v34, %v107_v42 }
 0x20d   :  { %v123_v47 = vadd.f32 %v223_v35, %v122_v44 }
 0x20e   :  { %v112_v50 = vsel %vm111_vm7, %v221_v34, %v108_v46 }
 0x20f   :  { %v127_v51 = vsel %vm126_vm8, %v223_v35, %v123_v47  ;;  %v117_v52 = vsel %vm114_vm9, %v116_v48, %v112_v50 }
 0x210   :  { %v132_v53 = vsel %vm129_vm10, %v131_v49, %v127_v51  ;;  %v118_v54 = vmul.f32 %v217_v23, %v117_v52 }
 0x211   :  { %v133_v55 = vmul.f32 %v219_v24, %v132_v53 }
 0x212   :  { %136 = vperm.xlu0 %214, %v118_v54  }
 0x213   :  { %141 = vperm.xlu1 %212, %v133_v55  }
 0x284   :  { %v137_v56 = vpop.permute.xlu0 %136 }
 0x285   :  { %v142_v57 = vpop.permute.xlu1 %141  ;;  %v144_v58 = vmul.f32 %v137_v56, %v361_v0  ;;  %v166_v59 = vperm.slane %v137_v56, %v369_v9 }
 0x286   :  { %v145_v60 = vmul.f32 %v142_v57, %v364_v3  ;;  %v167_v61 = vperm.slane %v142_v57, %v369_v9 }
 0x287   :  { %v146_v62 = vsel %vm53_vm0, %v144_v58, 0.0 }
 0x288   :  { %v153_v63 = vsel %vm53_vm0, %v145_v60, 0.0  ;;  %v147_v1 = vrot.slane %v146_v62, 4  ;;  %v168_v2 = vsel %vm66_vm1, %v167_v61, %v166_v59 }
 0x289   :  { %v154_v4 = vrot.slane %v153_v63, 4  ;;  %170 = vst.msk [vmem:[#allocation8] sm:$0x3] %vm69_vm2, %v168_v2 }
 0x28a   :  { %v148_v5 = vadd.f32 %v147_v1, %v146_v62  ;;  %192 = dma.vmem_to_hbm [thread:$0]  %s188_s1, 32, %s190_s26, [#allocation9]  }
 0x28b   :  { %v155_v0 = vadd.f32 %v154_v4, %v153_v63 }
 0x28c   :  { %v149_v6 = vrot.slane %v148_v5, 2 }
 0x28d   :  { %v156_v7 = vrot.slane %v155_v0, 2 }
 0x28e   :  { %v150_v3 = vadd.f32 %v149_v6, %v148_v5 }
 0x28f   :  { %v157_v8 = vadd.f32 %v156_v7, %v155_v0 }
 0x290   :  { %v151_v9 = vrot.slane %v150_v3, 1 }
 0x291   :  { %v158_v10 = vrot.slane %v157_v8, 1 }
 0x292   :  { %v152_v11 = vadd.f32 %v151_v9, %v150_v3 }
 0x293   :  { %v159_v12 = vadd.f32 %v158_v10, %v157_v8 }
 0x295   :  { %v162_v13 = vsel %vm66_vm1, %v159_v12, %v152_v11 }
 0x296   :  { %165 = vst.msk [vmem:[#allocation7] sm:$0x3] %vm164_vm11, %v162_v13 }
 0x297   :  { %181 = dma.vmem_to_hbm [thread:$0]  %s177_s27, 32, %s179_s30, [#allocation4]  }
 0x298   :  { %324 = dma.done.wait [#allocation4], 32  }
 0x299   :  { %325 = vsyncadd [#allocation4], 4294967264 }
 0x29a   :  { %326 = dma.done.wait [#allocation9], 32  }
 0x29b   :  { %327 = vsyncadd [#allocation9], 4294967264 }
 0x29c   :  { %201 = vsyncpa [#allocation3], 1 }
 0x29d   :  { %202 = vsyncpa [#allocation6], 1 }
 0x29e   :  { %203 = vsyncpa [#allocation4], 1 }
 0x29f   :  { %204 = vsyncpa [#allocation9], 1 }

</bundles_post_ra>
